<compile_context>
chip_gen: v5e
topology: v5e:2x2
jax: 0.10.0
libtpu: 0.0.40
codegen_flags: <defaults>
</compile_context>

<pallas_src>
import functools

import jax
import jax.numpy as jnp
from jax import lax
from jax.experimental import pallas as pl
from jax.experimental.pallas import tpu as pltpu

INPUT_DIM = 1024
HIDDEN_DIM = 32


def _round_up(x, m):
    return (x + m - 1) // m * m


def _ffnn_kernel(x_ref, w1_ref, b1_ref, w2_ref, b2_ref, o_ref, *, compute_dtype):
    # x_ref:  (TB, D)  input dtype (f32 or bf16)  batch on sublanes, features on lanes
    # w1_ref: (D, H)   compute dtype              resident across the grid
    # b1_ref: (1, H)   f32
    # w2_ref: (1, H)   f32                         torch fc2.weight layout
    # b2_ref: (1, 1)   f32                         SMEM scalar
    # o_ref:  (1, TB)  f32                         lane-dense probabilities row
    x = x_ref[...].astype(compute_dtype)                       # in-kernel cast (free, VPU slack)
    h = jnp.dot(x, w1_ref[...],
                preferred_element_type=jnp.float32)            # (TB, H) f32, MXU
    h = jnp.maximum(h + b1_ref[...], 0.0)                      # ReLU (VPU)
    # fc2: contract H of (1,H) against H of (TB,H) -> (1, TB).  Result comes out
    # lane-major so the store below is a dense, unmasked row write.  Any relayout of
    # the tiny (TB,32) h buffer is hidden under the DMA-bound regime.
    logits = lax.dot_general(
        w2_ref[...], h,
        dimension_numbers=(((1,), (1,)), ((), ())),
        preferred_element_type=jnp.float32)                    # (1, TB)
    logits = logits + b2_ref[0, 0]
    o_ref[...] = jax.nn.sigmoid(logits)


@functools.partial(jax.jit, static_argnames=("block_b", "use_bf16", "x_buffers"))
def feedforward_nn(x, w1_t, b1, w2, b2, *, block_b=2048, use_bf16=True, x_buffers=2):
    """Fused fc1 -> ReLU -> fc2 -> sigmoid.  x: (B, D) -> (B, 1) f32.

    Matches torch: sigmoid(relu(x @ fc1.weight.T + fc1.bias) @ fc2.weight.T + fc2.bias)
    with w1_t == fc1.weight.T (D, H) and w2 == fc2.weight (1, H).
    """
    B, D = x.shape
    H = w1_t.shape[1]

    # ---- tile sizing (all static) -------------------------------------------------
    # Lane-aligned (multiple of 128) batch tiles, clamped for tiny batches.
    block_b = max(128, min(int(block_b), _round_up(B, 128)))
    block_b = _round_up(block_b, 128)
    # v7x megacore: guarantee >= 2 grid steps when there's enough work so the
    # "parallel" batch axis can be sharded across both TensorCores.
    if B >= 256 and pl.cdiv(B, block_b) == 1:
        block_b = _round_up(pl.cdiv(B, 2), 128)
    num_tiles = pl.cdiv(B, block_b)
    b_pad_out = num_tiles * block_b  # only the tiny OUTPUT row is padded, never x.

    # ---- dtypes ---------------------------------------------------------------------
    # x is NOT cast here (that would be an extra full HBM pass); the kernel casts the
    # VMEM tile.  W1 is tiny (D*H) and resident, so casting it here is negligible.
    compute_dtype = jnp.bfloat16 if use_bf16 else jnp.float32
    w1_t = w1_t.astype(compute_dtype)
    b1 = b1.reshape(1, H).astype(jnp.float32)
    w2 = w2.reshape(1, H).astype(jnp.float32)
    b2 = b2.reshape(1, 1).astype(jnp.float32)

    # ---- VMEM budget: x double(+)-buffer dominates; keep <= 48 MiB (v7x has 64 MiB). --
    x_tile_bytes = block_b * D * jnp.dtype(x.dtype).itemsize
    vmem_limit = min(48 * 1024 * 1024,
                     max(32 * 1024 * 1024, x_buffers * x_tile_bytes + 8 * 1024 * 1024))

    x_spec_kwargs = {}
    if x_buffers != 2:  # optional pipeline-depth sweep on the x stream
        x_spec_kwargs["pipeline_mode"] = pl.Buffered(x_buffers)
    x_spec = pl.BlockSpec((block_b, D), lambda i: (i, 0), **x_spec_kwargs)

    # Ragged B: the last x tile is an edge block (Pallas pads it; padded rows are
    # undefined).  fc1 is row-independent and fc2 maps row r of h to output lane r,
    # so garbage rows only pollute output lanes >= B, which are sliced off below.
    out_row = pl.pallas_call(
        functools.partial(_ffnn_kernel, compute_dtype=compute_dtype),
        out_shape=jax.ShapeDtypeStruct((1, b_pad_out), jnp.float32),
        grid_spec=pltpu.PrefetchScalarGridSpec(
            num_scalar_prefetch=0,
            grid=(num_tiles,),
            in_specs=[
                x_spec,                                              # x tile (streamed)
                pl.BlockSpec((D, H), lambda i: (0, 0)),              # W1^T (full, resident)
                pl.BlockSpec((1, H), lambda i: (0, 0)),              # b1   (resident)
                pl.BlockSpec((1, H), lambda i: (0, 0)),              # W2 row (resident)
                pl.BlockSpec(memory_space=pltpu.MemorySpace.SMEM),   # b2 scalar
            ],
            out_specs=pl.BlockSpec((1, block_b), lambda i: (0, i)),  # lane-dense row
        ),
        compiler_params=pltpu.CompilerParams(
            dimension_semantics=("parallel",),
            vmem_limit_bytes=int(vmem_limit),
        ),
    )(x, w1_t, b1, w2, b2)

    return out_row[0, :B].reshape(B, 1)


def init_params(key, input_dim=INPUT_DIM, hidden_dim=HIDDEN_DIM):
    """Deterministic init mimicking torch.nn.Linear default U(-1/sqrt(fan_in), +)."""
    k1, k2, k3, k4 = jax.random.split(key, 4)
    bound1 = 1.0 / jnp.sqrt(jnp.float32(input_dim))
    bound2 = 1.0 / jnp.sqrt(jnp.float32(hidden_dim))
    # torch fc1.weight is (H, D) -> stored pre-transposed as (D, H).
    w1_t = jax.random.uniform(k1, (input_dim, hidden_dim), jnp.float32, -bound1, bound1)
    b1 = jax.random.uniform(k2, (1, hidden_dim), jnp.float32, -bound1, bound1)
    # torch fc2.weight is already (1, H); keep that layout.
    w2 = jax.random.uniform(k3, (1, hidden_dim), jnp.float32, -bound2, bound2)
    b2 = jax.random.uniform(k4, (1, 1), jnp.float32, -bound2, bound2)
    return w1_t, b1, w2, b2


if __name__ == "__main__":
    key = jax.random.PRNGKey(0)
    k_x1, k_x2, k_p = jax.random.split(key, 3)
    w1_t, b1, w2, b2 = init_params(k_p)

    def reference(x):
        h = jnp.maximum(x @ w1_t + b1, 0.0)
        return jax.nn.sigmoid(h @ w2.T + b2)

    ok = True

    # Small batch: single (partial) 128-row tile, edge-padded x read, masked output lanes.
    B1 = 16
    x1 = jax.random.normal(k_x1, (B1, INPUT_DIM), jnp.float32)
    out1 = jax.block_until_ready(feedforward_nn(x1, w1_t, b1, w2, b2))
    ok &= out1.shape == (B1, 1)
    ok &= bool(jnp.allclose(out1, reference(x1), atol=2e-2))

    # Ragged multi-tile grid: cdiv(300,128)=3 tiles, last tile partial (no jnp.pad of x).
    B2 = 300
    x2 = jax.random.normal(k_x2, (B2, INPUT_DIM), jnp.float32)
    out2 = jax.block_until_ready(feedforward_nn(x2, w1_t, b1, w2, b2, block_b=128))
    ok &= out2.shape == (B2, 1)
    ok &= bool(jnp.allclose(out2, reference(x2), atol=2e-2))

    # Exact-f32 path; also exercises the v7x >=2-step grid split (block_b 384 -> 256).
    out3 = jax.block_until_ready(feedforward_nn(x2, w1_t, b1, w2, b2, use_bf16=False))
    ok &= out3.shape == (B2, 1)
    ok &= bool(jnp.allclose(out3, reference(x2), atol=1e-5))

    assert ok, "Pallas FeedforwardNN does not match the reference forward"
    print("KERNEL_OK")
</pallas_src>

<mosaic_0001>
module attributes {stable_mosaic.version = 11 : i64} {
  func.func @_ffnn_kernel(%arg0: i32, %arg1: memref<128x1024xf32, #tpu.memory_space<vmem>>, %arg2: memref<1024x32xbf16, #tpu.memory_space<vmem>>, %arg3: memref<1x32xf32, #tpu.memory_space<vmem>>, %arg4: memref<1x32xf32, #tpu.memory_space<vmem>>, %arg5: memref<1x1xf32, #tpu.memory_space<smem>>, %arg6: memref<1x128xf32, #tpu.memory_space<vmem>>) attributes {dimension_semantics = [#tpu.dimension_semantics<parallel>], iteration_bounds = array<i64: 1>, scalar_prefetch = 0 : i64, scratch_operands = 0 : i64, tpu.core_type = #tpu.core_type<tc>, window_params = [{transform_indices = @transform_0, window_bounds = array<i64: 128, 1024>}, {pipeline_mode = #tpu.pipeline_mode<synchronous>, transform_indices = @transform_1, window_bounds = array<i64: 1024, 32>}, {pipeline_mode = #tpu.pipeline_mode<synchronous>, transform_indices = @transform_2, window_bounds = array<i64: 1, 32>}, {pipeline_mode = #tpu.pipeline_mode<synchronous>, transform_indices = @transform_3, window_bounds = array<i64: 1, 32>}, {transform_indices = @transform_4, window_bounds = array<i64: 1, 1>}, {transform_indices = @transform_5, window_bounds = array<i64: 1, 128>}]} {
    %c0 = arith.constant 0 : index
    %c0_0 = arith.constant 0 : index
    %0 = vector.load %arg1[%c0, %c0_0] : memref<128x1024xf32, #tpu.memory_space<vmem>>, vector<128x1024xf32>
    %1 = arith.truncf %0 : vector<128x1024xf32> to vector<128x1024xbf16>
    %c0_1 = arith.constant 0 : index
    %c0_2 = arith.constant 0 : index
    %2 = vector.load %arg2[%c0_1, %c0_2] : memref<1024x32xbf16, #tpu.memory_space<vmem>>, vector<1024x32xbf16>
    %cst = arith.constant dense<0.000000e+00> : vector<128x32xf32>
    %3 = tpu.matmul %1, %2, %cst {dimension_numbers = #tpu.dot_dimension_numbers<[1], [0], [0], [1], [0, 0, 1, 1], [], []>} : vector<128x1024xbf16>, vector<1024x32xbf16>, vector<128x32xf32> -> vector<128x32xf32>
    %c0_3 = arith.constant 0 : index
    %c0_4 = arith.constant 0 : index
    %4 = vector.load %arg3[%c0_3, %c0_4] : memref<1x32xf32, #tpu.memory_space<vmem>>, vector<1x32xf32>
    %5 = vector.broadcast %4 : vector<1x32xf32> to vector<128x32xf32>
    %6 = arith.addf %3, %5 : vector<128x32xf32>
    %cst_5 = arith.constant 0.000000e+00 : f32
    %7 = vector.broadcast %cst_5 : f32 to vector<128x32xf32>
    %8 = arith.maximumf %6, %7 : vector<128x32xf32>
    %c0_6 = arith.constant 0 : index
    %c0_7 = arith.constant 0 : index
    %9 = vector.load %arg4[%c0_6, %c0_7] : memref<1x32xf32, #tpu.memory_space<vmem>>, vector<1x32xf32>
    %cst_8 = arith.constant dense<0.000000e+00> : vector<1x128xf32>
    %10 = tpu.matmul %9, %8, %cst_8 {dimension_numbers = #tpu.dot_dimension_numbers<[1], [1], [0], [0], [0, 0, 1, 0], [], []>} : vector<1x32xf32>, vector<128x32xf32>, vector<1x128xf32> -> vector<1x128xf32>
    %c0_9 = arith.constant 0 : index
    %c0_10 = arith.constant 0 : index
    %11 = memref.load %arg5[%c0_9, %c0_10] : memref<1x1xf32, #tpu.memory_space<smem>>
    %12 = vector.broadcast %11 : f32 to vector<1x128xf32>
    %13 = arith.addf %10, %12 : vector<1x128xf32>
    %14 = arith.negf %13 : vector<1x128xf32>
    %15 = math.exp %14 : vector<1x128xf32>
    %cst_11 = arith.constant 1.000000e+00 : f32
    %16 = vector.broadcast %cst_11 : f32 to vector<1x128xf32>
    %17 = arith.addf %16, %15 : vector<1x128xf32>
    %18 = arith.divf %16, %17 : vector<1x128xf32>
    %c0_12 = arith.constant 0 : index
    %c0_13 = arith.constant 0 : index
    %19 = vector.load %arg6[%c0_12, %c0_13] : memref<1x128xf32, #tpu.memory_space<vmem>>, vector<1x128xf32>
    tpu.vector_store %arg6[%c0_12, %c0_13], %18 {strides = array<i32>} : memref<1x128xf32, #tpu.memory_space<vmem>>, vector<1x128xf32>,
    return
  }
  func.func @transform_0(%arg0: i32) -> (i32, i32) {
    %c0_i32 = arith.constant 0 : i32
    %c0_i32_0 = arith.constant 0 : i32
    return %arg0, %c0_i32 : i32, i32
  }
  func.func @transform_1(%arg0: i32) -> (i32, i32) {
    %c0_i32 = arith.constant 0 : i32
    %c0_i32_0 = arith.constant 0 : i32
    %c0_i32_1 = arith.constant 0 : i32
    return %c0_i32, %c0_i32_0 : i32, i32
  }
  func.func @transform_2(%arg0: i32) -> (i32, i32) {
    %c0_i32 = arith.constant 0 : i32
    %c0_i32_0 = arith.constant 0 : i32
    %c0_i32_1 = arith.constant 0 : i32
    return %c0_i32, %c0_i32_0 : i32, i32
  }
  func.func @transform_3(%arg0: i32) -> (i32, i32) {
    %c0_i32 = arith.constant 0 : i32
    %c0_i32_0 = arith.constant 0 : i32
    %c0_i32_1 = arith.constant 0 : i32
    return %c0_i32, %c0_i32_0 : i32, i32
  }
  func.func @transform_4(%arg0: i32) -> (i32, i32) {
    %c0_i32 = arith.constant 0 : i32
    %c0_i32_0 = arith.constant 0 : i32
    %c0_i32_1 = arith.constant 0 : i32
    return %c0_i32, %c0_i32_0 : i32, i32
  }
  func.func @transform_5(%arg0: i32) -> (i32, i32) {
    %c0_i32 = arith.constant 0 : i32
    %c0_i32_0 = arith.constant 0 : i32
    return %c0_i32, %arg0 : i32, i32
  }
}

</mosaic_0001>

<bundles_post_ra>
// kernel: feedforward_nn.1
= control target key start
LH: loop header
LB: loop body
LE: loop exit
PB: predicated region body
PF: predicated region fallthrough
CT: control target
= control target key end

     0   :  { %vm1140_vm0 = vcmask 261120   ;;  %s2307_s1 = inlined_call_operand.vmem [shape: bf16[1024,32], index: 1, kind: input, shape index: {}]   ;;  %s2308_s2 = inlined_call_operand.vmem [shape: f32[1,32], index: 2, kind: input, shape index: {}]   ;;  %s2309_s0 = inlined_call_operand.vmem [shape: f32[16,1024], index: 0, kind: input, shape index: {}]   ;;  %s2310_s3 = inlined_call_operand.vmem [shape: f32[1,32], index: 3, kind: input, shape index: {}]   ;;  %s2311_s4 = inlined_call_operand.<no memory space> [shape: f32[1,1], index: 4, kind: input, shape index: {}]   ;;  %s2312_s5 = inlined_call_operand.vmem [shape: f32[1,128], index: 5, kind: output, shape index: {}]  }
   0x1   :  { %v1517_v0 = vld [vmem:[%s2307_s1 + $0x38] sm:$0xff]  ;;  %v1516_v4 = vld [vmem:[%s2307_s1 + $0x30] sm:$0xff]  ;;  %v1515_v8 = vld [vmem:[%s2307_s1 + $0x28] sm:$0xff] }
   0x2   :  { %v1525_v1 = vld [vmem:[%s2307_s1 + $0x78] sm:$0xff]  ;;  %729 = vmatpush.bf16.msra.mxu0 %v1517_v0  ;;  %v1524_v5 = vld [vmem:[%s2307_s1 + $0x70] sm:$0xff]  ;;  %v1523_v9 = vld [vmem:[%s2307_s1 + $0x68] sm:$0xff] }
   0x3   :  { %v1533_v2 = vld [vmem:[%s2307_s1 + $0xb8] sm:$0xff]  ;;  %778 = vmatpush.bf16.msra.mxu1 %v1525_v1  ;;  %v1532_v6 = vld [vmem:[%s2307_s1 + $0xb0] sm:$0xff]  ;;  %v1531_v10 = vld [vmem:[%s2307_s1 + $0xa8] sm:$0xff] }
   0x4   :  { %v1541_v3 = vld [vmem:[%s2307_s1 + $0xf8] sm:$0xff]  ;;  %827 = vmatpush.bf16.msra.mxu2 %v1533_v2  ;;  %v1540_v7 = vld [vmem:[%s2307_s1 + $0xf0] sm:$0xff]  ;;  %v1539_v11 = vld [vmem:[%s2307_s1 + $0xe8] sm:$0xff] }
   0x5   :  { %876 = vmatpush.bf16.msra.mxu3 %v1541_v3  ;;  %v1514_v12 = vld [vmem:[%s2307_s1 + $0x20] sm:$0xff]  ;;  %v1513_v16 = vld [vmem:[%s2307_s1 + $0x18] sm:$0xff]  ;;  %v1512_v20 = vld [vmem:[%s2307_s1 + $0x10] sm:$0xff] }
   0x6   :  { %730 = vmatpush.bf16.msra.mxu0 %v1516_v4  ;;  %v1522_v13 = vld [vmem:[%s2307_s1 + $0x60] sm:$0xff]  ;;  %v1521_v17 = vld [vmem:[%s2307_s1 + $0x58] sm:$0xff]  ;;  %v1520_v21 = vld [vmem:[%s2307_s1 + $0x50] sm:$0xff] }
   0x7   :  { %779 = vmatpush.bf16.msra.mxu1 %v1524_v5  ;;  %v1530_v14 = vld [vmem:[%s2307_s1 + $0xa0] sm:$0xff]  ;;  %v1529_v18 = vld [vmem:[%s2307_s1 + $0x98] sm:$0xff]  ;;  %v1528_v22 = vld [vmem:[%s2307_s1 + $0x90] sm:$0xff] }
   0x8   :  { %828 = vmatpush.bf16.msra.mxu2 %v1532_v6  ;;  %v1538_v15 = vld [vmem:[%s2307_s1 + $0xe0] sm:$0xff]  ;;  %v1537_v19 = vld [vmem:[%s2307_s1 + $0xd8] sm:$0xff]  ;;  %v1536_v23 = vld [vmem:[%s2307_s1 + $0xd0] sm:$0xff] }
   0x9   :  { %877 = vmatpush.bf16.msra.mxu3 %v1540_v7  ;;  %v1511_v24 = vld [vmem:[%s2307_s1 + $0x8] sm:$0xff]  ;;  %v1510_v28 = vld [vmem:[%s2307_s1] sm:$0xff]  ;;  %v23_v36 = vld [vmem:[%s2309_s0 + $0x10] sm:$0xff] }
   0xa   :  { %731 = vmatpush.bf16.msra.mxu0 %v1515_v8  ;;  %v1519_v25 = vld [vmem:[%s2307_s1 + $0x48] sm:$0xff]  ;;  %v1518_v29 = vld [vmem:[%s2307_s1 + $0x40] sm:$0xff]  ;;  %v31_v37 = vld [vmem:[%s2309_s0 + $0x50] sm:$0xff] }
   0xb   :  { %780 = vmatpush.bf16.msra.mxu1 %v1523_v9  ;;  %v1527_v26 = vld [vmem:[%s2307_s1 + $0x88] sm:$0xff]  ;;  %v1526_v30 = vld [vmem:[%s2307_s1 + $0x80] sm:$0xff]  ;;  %v24_v38 = vld [vmem:[%s2309_s0 + $0x18] sm:$0xff]  ;;  %v151_v42 = vpack.c.bf16 %v31_v37, %v23_v36 }
   0xc   :  { %829 = vmatpush.bf16.msra.mxu2 %v1531_v10  ;;  %v1535_v27 = vld [vmem:[%s2307_s1 + $0xc8] sm:$0xff]  ;;  %v1534_v31 = vld [vmem:[%s2307_s1 + $0xc0] sm:$0xff]  ;;  %v32_v39 = vld [vmem:[%s2309_s0 + $0x58] sm:$0xff] }
   0xd   :  { %878 = vmatpush.bf16.msra.mxu3 %v1539_v11  ;;  %v21_v32 = vld [vmem:[%s2309_s0] sm:$0xff]  ;;  %v22_v34 = vld [vmem:[%s2309_s0 + $0x8] sm:$0xff]  ;;  %v152_v43 = vpack.c.bf16 %v32_v39, %v24_v38  ;;  %v39_v48 = vld [vmem:[%s2309_s0 + $0x90] sm:$0xff] }
   0xe   :  { %732 = vmatpush.bf16.msra.mxu0 %v1514_v12  ;;  %v29_v33 = vld [vmem:[%s2309_s0 + $0x40] sm:$0xff]  ;;  %v30_v35 = vld [vmem:[%s2309_s0 + $0x48] sm:$0xff]  ;;  %v47_v49 = vld [vmem:[%s2309_s0 + $0xd0] sm:$0xff] }
   0xf   :  { %781 = vmatpush.bf16.msra.mxu1 %v1522_v13  ;;  %v149_v40 = vpack.c.bf16 %v29_v33, %v21_v32  ;;  %v150_v41 = vpack.c.bf16 %v30_v35, %v22_v34  ;;  %v37_v44 = vld [vmem:[%s2309_s0 + $0x80] sm:$0xff]  ;;  %v38_v46 = vld [vmem:[%s2309_s0 + $0x88] sm:$0xff]  ;;  %v40_v50 = vld [vmem:[%s2309_s0 + $0x98] sm:$0xff]  ;;  %v159_v54 = vpack.c.bf16 %v47_v49, %v39_v48 }
  0x10   :  { %830 = vmatpush.bf16.msra.mxu2 %v1530_v14  ;;  %v45_v45 = vld [vmem:[%s2309_s0 + $0xc0] sm:$0xff]  ;;  %v46_v47 = vld [vmem:[%s2309_s0 + $0xc8] sm:$0xff]  ;;  %v48_v51 = vld [vmem:[%s2309_s0 + $0xd8] sm:$0xff] }
  0x11   :  { %879 = vmatpush.bf16.msra.mxu3 %v1538_v15  ;;  %v157_v52 = vpack.c.bf16 %v45_v45, %v37_v44  ;;  %v158_v53 = vpack.c.bf16 %v46_v47, %v38_v46  ;;  %v160_v55 = vpack.c.bf16 %v48_v51, %v40_v50  ;;  %v53_v56 = vld [vmem:[%s2309_s0 + $0x100] sm:$0xff]  ;;  %v54_v58 = vld [vmem:[%s2309_s0 + $0x108] sm:$0xff]  ;;  %v55_v60 = vld [vmem:[%s2309_s0 + $0x110] sm:$0xff] }
  0x12   :  { %733 = vmatpush.bf16.msra.mxu0 %v1513_v16  ;;  %v61_v57 = vld [vmem:[%s2309_s0 + $0x140] sm:$0xff]  ;;  %v62_v59 = vld [vmem:[%s2309_s0 + $0x148] sm:$0xff]  ;;  %v63_v61 = vld [vmem:[%s2309_s0 + $0x150] sm:$0xff] }
  0x13   :  { %782 = vmatpush.bf16.msra.mxu1 %v1521_v17  ;;  %v56_v62 = vld [vmem:[%s2309_s0 + $0x118] sm:$0xff]  ;;  %v165_v0 = vpack.c.bf16 %v61_v57, %v53_v56  ;;  %v166_v1 = vpack.c.bf16 %v62_v59, %v54_v58  ;;  %v167_v2 = vpack.c.bf16 %v63_v61, %v55_v60  ;;  %v69_v8 = vld [vmem:[%s2309_s0 + $0x180] sm:$0xff]  ;;  %v70_v10 = vld [vmem:[%s2309_s0 + $0x188] sm:$0xff] }
  0x14   :  { %831 = vmatpush.bf16.msra.mxu2 %v1529_v18  ;;  %v64_v63 = vld [vmem:[%s2309_s0 + $0x158] sm:$0xff]  ;;  %v77_v9 = vld [vmem:[%s2309_s0 + $0x1c0] sm:$0xff]  ;;  %v78_v11 = vld [vmem:[%s2309_s0 + $0x1c8] sm:$0xff] }
  0x15   :  { %880 = vmatpush.bf16.msra.mxu3 %v1537_v19  ;;  %v168_v3 = vpack.c.bf16 %v64_v63, %v56_v62  ;;  %v1565_v4 = vld [vmem:[%s2307_s1 + $0x1b8] sm:$0xff]  ;;  %v71_v12 = vld [vmem:[%s2309_s0 + $0x190] sm:$0xff]  ;;  %v173_v16 = vpack.c.bf16 %v77_v9, %v69_v8  ;;  %v174_v17 = vpack.c.bf16 %v78_v11, %v70_v10  ;;  %v1563_v36 = vld [vmem:[%s2307_s1 + $0x1a8] sm:$0xff] }
  0x16   :  { %734 = vmatpush.bf16.msra.mxu0 %v1512_v20  ;;  %v1549_v5 = vld [vmem:[%s2307_s1 + $0x138] sm:$0xff]  ;;  %v79_v13 = vld [vmem:[%s2309_s0 + $0x1d0] sm:$0xff]  ;;  %v1547_v37 = vld [vmem:[%s2307_s1 + $0x128] sm:$0xff] }
  0x17   :  { %783 = vmatpush.bf16.msra.mxu1 %v1520_v21  ;;  %v1573_v6 = vld [vmem:[%s2307_s1 + $0x1f8] sm:$0xff]  ;;  %v175_v18 = vpack.c.bf16 %v79_v13, %v71_v12  ;;  %v1564_v20 = vld [vmem:[%s2307_s1 + $0x1b0] sm:$0xff]  ;;  %v1571_v38 = vld [vmem:[%s2307_s1 + $0x1e8] sm:$0xff] }
  0x18   :  { %832 = vmatpush.bf16.msra.mxu2 %v1528_v22  ;;  %v1557_v7 = vld [vmem:[%s2307_s1 + $0x178] sm:$0xff]  ;;  %v1548_v21 = vld [vmem:[%s2307_s1 + $0x130] sm:$0xff]  ;;  %v1555_v39 = vld [vmem:[%s2307_s1 + $0x168] sm:$0xff] }
  0x19   :  { %881 = vmatpush.bf16.msra.mxu3 %v1536_v23  ;;  %v72_v14 = vld [vmem:[%s2309_s0 + $0x198] sm:$0xff]  ;;  %v1572_v22 = vld [vmem:[%s2307_s1 + $0x1f0] sm:$0xff]  ;;  %v101_v44 = vld [vmem:[%s2309_s0 + $0x280] sm:$0xff] }
  0x1a   :  { %735 = vmatpush.bf16.msra.mxu0 %v1511_v24  ;;  %v80_v15 = vld [vmem:[%s2309_s0 + $0x1d8] sm:$0xff]  ;;  %v1556_v23 = vld [vmem:[%s2307_s1 + $0x170] sm:$0xff]  ;;  %v85_v24 = vld [vmem:[%s2309_s0 + $0x200] sm:$0xff] }
  0x1b   :  { %784 = vmatpush.bf16.msra.mxu1 %v1519_v25  ;;  %v176_v19 = vpack.c.bf16 %v80_v15, %v72_v14  ;;  %v93_v25 = vld [vmem:[%s2309_s0 + $0x240] sm:$0xff]  ;;  %v102_v46 = vld [vmem:[%s2309_s0 + $0x288] sm:$0xff]  ;;  %v103_v48 = vld [vmem:[%s2309_s0 + $0x290] sm:$0xff] }
  0x1c   :  { %833 = vmatpush.bf16.msra.mxu2 %v1527_v26  ;;  %v86_v26 = vld [vmem:[%s2309_s0 + $0x208] sm:$0xff]  ;;  %v181_v32 = vpack.c.bf16 %v93_v25, %v85_v24  ;;  %v109_v45 = vld [vmem:[%s2309_s0 + $0x2c0] sm:$0xff]  ;;  %v111_v49 = vld [vmem:[%s2309_s0 + $0x2d0] sm:$0xff] }
  0x1d   :  { %882 = vmatpush.bf16.msra.mxu3 %v1535_v27  ;;  %v94_v27 = vld [vmem:[%s2309_s0 + $0x248] sm:$0xff]  ;;  %v104_v50 = vld [vmem:[%s2309_s0 + $0x298] sm:$0xff]  ;;  %v1544_v60 = vld [vmem:[%s2307_s1 + $0x110] sm:$0xff] }
  0x1e   :  { %736 = vmatpush.bf16.msra.mxu0 %v1510_v28  ;;  %v87_v28 = vld [vmem:[%s2309_s0 + $0x210] sm:$0xff]  ;;  %v182_v33 = vpack.c.bf16 %v94_v27, %v86_v26  ;;  %v110_v47 = vld [vmem:[%s2309_s0 + $0x2c8] sm:$0xff]  ;;  %v112_v51 = vld [vmem:[%s2309_s0 + $0x2d8] sm:$0xff] }
  0x1f   :  { %785 = vmatpush.bf16.msra.mxu1 %v1518_v29  ;;  %v95_v29 = vld [vmem:[%s2309_s0 + $0x250] sm:$0xff]  ;;  %v1545_v56 = vld [vmem:[%s2307_s1 + $0x118] sm:$0xff]  ;;  %v1542_v14 = vld [vmem:[%s2307_s1 + $0x100] sm:$0xff] }
  0x20   :  { %834 = vmatpush.bf16.msra.mxu2 %v1526_v30  ;;  %v88_v30 = vld [vmem:[%s2309_s0 + $0x218] sm:$0xff]  ;;  %v183_v34 = vpack.c.bf16 %v95_v29, %v87_v28  ;;  %v1552_v61 = vld [vmem:[%s2307_s1 + $0x150] sm:$0xff]  ;;  %v1550_v15 = vld [vmem:[%s2307_s1 + $0x140] sm:$0xff] }
  0x21   :  { %883 = vmatpush.bf16.msra.mxu3 %v1534_v31  ;;  %737 = vmatmul.bf16.vlgmr.msra.gmra.mxu0 %v149_v40  ;;  %v96_v31 = vld [vmem:[%s2309_s0 + $0x258] sm:$0xff]  ;;  %v1546_v40 = vld [vmem:[%s2307_s1 + $0x120] sm:$0xff]  ;;  %v1560_v62 = vld [vmem:[%s2307_s1 + $0x190] sm:$0xff] }
  0x22   :  { %786 = vmatmul.bf16.vlgmr.msra.gmra.mxu1 %v150_v41  ;;  %925 = vmatpush.bf16.msrb.mxu0 %v1549_v5  ;;  %v184_v35 = vpack.c.bf16 %v96_v31, %v88_v30  ;;  %v1562_v41 = vld [vmem:[%s2307_s1 + $0x1a0] sm:$0xff]  ;;  %v1553_v57 = vld [vmem:[%s2307_s1 + $0x158] sm:$0xff]  ;;  %v1568_v63 = vld [vmem:[%s2307_s1 + $0x1d0] sm:$0xff] }
  0x23   :  { %835 = vmatmul.bf16.vlgmr.msra.gmra.mxu2 %v151_v42  ;;  %974 = vmatpush.bf16.msrb.mxu1 %v1557_v7  ;;  %v1554_v42 = vld [vmem:[%s2307_s1 + $0x160] sm:$0xff]  ;;  %v1561_v58 = vld [vmem:[%s2307_s1 + $0x198] sm:$0xff]  ;;  %v126_v7 = vld [vmem:[%s2309_s0 + $0x348] sm:$0xff] }
  0x24   :  { %884 = vmatmul.bf16.vlgmr.msra.gmra.mxu3 %v152_v43  ;;  %1023 = vmatpush.bf16.msrb.mxu2 %v1565_v4  ;;  %v1570_v43 = vld [vmem:[%s2307_s1 + $0x1e0] sm:$0xff]  ;;  %v1569_v59 = vld [vmem:[%s2307_s1 + $0x1d8] sm:$0xff]  ;;  %v119_v8 = vld [vmem:[%s2309_s0 + $0x310] sm:$0xff] }
  0x25   :  { %1072 = vmatpush.bf16.msrb.mxu3 %v1573_v6  ;;  %v117_v4 = vld [vmem:[%s2309_s0 + $0x300] sm:$0xff]  ;;  %v118_v6 = vld [vmem:[%s2309_s0 + $0x308] sm:$0xff]  ;;  %v127_v9 = vld [vmem:[%s2309_s0 + $0x350] sm:$0xff] }
  0x26   :  { %926 = vmatpush.bf16.msrb.mxu0 %v1548_v21  ;;  %v125_v5 = vld [vmem:[%s2309_s0 + $0x340] sm:$0xff]  ;;  %v120_v10 = vld [vmem:[%s2309_s0 + $0x318] sm:$0xff]  ;;  %v198_v13 = vpack.c.bf16 %v126_v7, %v118_v6  ;;  %v135_v24 = vld [vmem:[%s2309_s0 + $0x390] sm:$0xff] }
  0x27   :  { %975 = vmatpush.bf16.msrb.mxu1 %v1556_v23  ;;  %v128_v11 = vld [vmem:[%s2309_s0 + $0x358] sm:$0xff]  ;;  %v197_v12 = vpack.c.bf16 %v125_v5, %v117_v4  ;;  %v141_v21 = vld [vmem:[%s2309_s0 + $0x3c0] sm:$0xff]  ;;  %v142_v23 = vld [vmem:[%s2309_s0 + $0x3c8] sm:$0xff] }
  0x28   :  { %1024 = vmatpush.bf16.msrb.mxu2 %v1564_v20  ;;  %v133_v20 = vld [vmem:[%s2309_s0 + $0x380] sm:$0xff]  ;;  %v143_v25 = vld [vmem:[%s2309_s0 + $0x3d0] sm:$0xff]  ;;  %v136_v26 = vld [vmem:[%s2309_s0 + $0x398] sm:$0xff] }
  0x29   :  { %1073 = vmatpush.bf16.msrb.mxu3 %v1572_v22  ;;  %v134_v22 = vld [vmem:[%s2309_s0 + $0x388] sm:$0xff]  ;;  %v144_v27 = vld [vmem:[%s2309_s0 + $0x3d8] sm:$0xff]  ;;  %v205_v28 = vpack.c.bf16 %v141_v21, %v133_v20  ;;  %v207_v30 = vpack.c.bf16 %v143_v25, %v135_v24  ;;  %v57_v21 = vld [vmem:[%s2309_s0 + $0x120] sm:$0xff] }
  0x2a   :  { %927 = vmatpush.bf16.msrb.mxu0 %v1547_v37  ;;  %v206_v29 = vpack.c.bf16 %v142_v23, %v134_v22  ;;  %v208_v31 = vpack.c.bf16 %v144_v27, %v136_v26  ;;  %v27_v37 = vld [vmem:[%s2309_s0 + $0x30] sm:$0xff]  ;;  %v65_v22 = vld [vmem:[%s2309_s0 + $0x160] sm:$0xff]  ;;  %v58_v23 = vld [vmem:[%s2309_s0 + $0x128] sm:$0xff] }
  0x2b   :  { %976 = vmatpush.bf16.msrb.mxu1 %v1555_v39  ;;  %v28_v39 = vld [vmem:[%s2309_s0 + $0x38] sm:$0xff]  ;;  %v66_v24 = vld [vmem:[%s2309_s0 + $0x168] sm:$0xff]  ;;  %v59_v25 = vld [vmem:[%s2309_s0 + $0x130] sm:$0xff] }
  0x2c   :  { %1025 = vmatpush.bf16.msrb.mxu2 %v1563_v36  ;;  %v34_v36 = vld [vmem:[%s2309_s0 + $0x68] sm:$0xff]  ;;  %v67_v26 = vld [vmem:[%s2309_s0 + $0x170] sm:$0xff]  ;;  %v60_v27 = vld [vmem:[%s2309_s0 + $0x138] sm:$0xff] }
  0x2d   :  { %1074 = vmatpush.bf16.msrb.mxu3 %v1571_v38  ;;  %v35_v38 = vld [vmem:[%s2309_s0 + $0x70] sm:$0xff] }
  0x2e   :  { %928 = vmatpush.bf16.msrb.mxu0 %v1546_v40  ;;  %v36_v40 = vld [vmem:[%s2309_s0 + $0x78] sm:$0xff] }
  0x2f   :  { %977 = vmatpush.bf16.msrb.mxu1 %v1554_v42 }
  0x30   :  { %1026 = vmatpush.bf16.msrb.mxu2 %v1562_v41 }
  0x31   :  { %742 = vmatmul.bf16.gmra.mxu0 %v157_v52  ;;  %1075 = vmatpush.bf16.msrb.mxu3 %v1570_v43  ;;  %v189_v52 = vpack.c.bf16 %v109_v45, %v101_v44  ;;  %v155_v45 = vpack.c.bf16 %v35_v38, %v27_v37  ;;  %v171_v37 = vpack.c.bf16 %v67_v26, %v59_v25 }
  0x32   :  { %791 = vmatmul.bf16.gmra.mxu1 %v158_v53  ;;  %v190_v53 = vpack.c.bf16 %v110_v47, %v102_v46  ;;  %929 = vmatpush.bf16.msrb.mxu0 %v1545_v56  ;;  %v156_v46 = vpack.c.bf16 %v36_v40, %v28_v39 }
  0x33   :  { %840 = vmatmul.bf16.gmra.mxu2 %v159_v54  ;;  %v191_v54 = vpack.c.bf16 %v111_v49, %v103_v48  ;;  %978 = vmatpush.bf16.msrb.mxu1 %v1553_v57  ;;  %v41_v57 = vld [vmem:[%s2309_s0 + $0xa0] sm:$0xff] }
  0x34   :  { %889 = vmatmul.bf16.gmra.mxu3 %v160_v55  ;;  %v192_v55 = vpack.c.bf16 %v112_v51, %v104_v50  ;;  %1027 = vmatpush.bf16.msrb.mxu2 %v1561_v58  ;;  %v49_v58 = vld [vmem:[%s2309_s0 + $0xe0] sm:$0xff] }
  0x35   :  { %1076 = vmatpush.bf16.msrb.mxu3 %v1569_v59  ;;  %v42_v59 = vld [vmem:[%s2309_s0 + $0xa8] sm:$0xff] }
  0x36   :  { %930 = vmatpush.bf16.msrb.mxu0 %v1544_v60  ;;  %v50_v60 = vld [vmem:[%s2309_s0 + $0xe8] sm:$0xff] }
  0x37   :  { %979 = vmatpush.bf16.msrb.mxu1 %v1552_v61  ;;  %v43_v61 = vld [vmem:[%s2309_s0 + $0xb0] sm:$0xff]  ;;  %v162_v4 = vpack.c.bf16 %v50_v60, %v42_v59 }
  0x38   :  { %1028 = vmatpush.bf16.msrb.mxu2 %v1560_v62  ;;  %v51_v62 = vld [vmem:[%s2309_s0 + $0xf0] sm:$0xff] }
  0x39   :  { %1077 = vmatpush.bf16.msrb.mxu3 %v1568_v63  ;;  %v44_v63 = vld [vmem:[%s2309_s0 + $0xb8] sm:$0xff] }
  0x41   :  { %747 = vmatmul.bf16.gmra.mxu0 %v165_v0  ;;  %v1543_v0 = vld [vmem:[%s2307_s1 + $0x108] sm:$0xff] }
  0x42   :  { %796 = vmatmul.bf16.gmra.mxu1 %v166_v1  ;;  %v1551_v1 = vld [vmem:[%s2307_s1 + $0x148] sm:$0xff]  ;;  %931 = vmatpush.bf16.msrb.mxu0 %v1543_v0  ;;  %v52_v0 = vld [vmem:[%s2309_s0 + $0xf8] sm:$0xff] }
  0x43   :  { %845 = vmatmul.bf16.gmra.mxu2 %v167_v2  ;;  %v1559_v2 = vld [vmem:[%s2307_s1 + $0x188] sm:$0xff]  ;;  %980 = vmatpush.bf16.msrb.mxu1 %v1551_v1 }
  0x44   :  { %894 = vmatmul.bf16.gmra.mxu3 %v168_v3  ;;  %v1567_v3 = vld [vmem:[%s2307_s1 + $0x1c8] sm:$0xff]  ;;  %1029 = vmatpush.bf16.msrb.mxu2 %v1559_v2 }
  0x45   :  { %1078 = vmatpush.bf16.msrb.mxu3 %v1567_v3  ;;  %v161_v3 = vpack.c.bf16 %v49_v58, %v41_v57  ;;  %v76_v57 = vld [vmem:[%s2309_s0 + $0x1b8] sm:$0xff] }
  0x46   :  { %932 = vmatpush.bf16.msrb.mxu0 %v1542_v14  ;;  %v84_v58 = vld [vmem:[%s2309_s0 + $0x1f8] sm:$0xff] }
  0x47   :  { %981 = vmatpush.bf16.msrb.mxu1 %v1550_v15 }
  0x51   :  { %752 = vmatmul.bf16.gmra.mxu0 %v173_v16  ;;  %v1558_v16 = vld [vmem:[%s2307_s1 + $0x180] sm:$0xff] }
  0x52   :  { %801 = vmatmul.bf16.gmra.mxu1 %v174_v17  ;;  %v199_v17 = vpack.c.bf16 %v127_v9, %v119_v8  ;;  %1030 = vmatpush.bf16.msrb.mxu2 %v1558_v16  ;;  %v163_v8 = vpack.c.bf16 %v51_v62, %v43_v61  ;;  %v164_v9 = vpack.c.bf16 %v52_v0, %v44_v63 }
  0x53   :  { %850 = vmatmul.bf16.gmra.mxu2 %v175_v18  ;;  %v200_v18 = vpack.c.bf16 %v128_v11, %v120_v10 }
  0x54   :  { %899 = vmatmul.bf16.gmra.mxu3 %v176_v19  ;;  %v1566_v19 = vld [vmem:[%s2307_s1 + $0x1c0] sm:$0xff] }
  0x55   :  { %1079 = vmatpush.bf16.msrb.mxu3 %v1566_v19 }
  0x61   :  { %757 = vmatmul.bf16.gmra.mxu0 %v181_v32  ;;  %v1996_v32 = vld [vmem:[%s2308_s2] ss:$0 sm:$0xff] }
  0x62   :  { %806 = vmatmul.bf16.gmra.mxu1 %v182_v33  ;;  %v25_v33 = vld [vmem:[%s2309_s0 + $0x20] sm:$0xff] }
  0x63   :  { %855 = vmatmul.bf16.gmra.mxu2 %v183_v34  ;;  %v33_v34 = vld [vmem:[%s2309_s0 + $0x60] sm:$0xff] }
  0x64   :  { %904 = vmatmul.bf16.gmra.mxu3 %v184_v35  ;;  %v26_v35 = vld [vmem:[%s2309_s0 + $0x28] sm:$0xff]  ;;  %v153_v41 = vpack.c.bf16 %v33_v34, %v25_v33  ;;  %v170_v33 = vpack.c.bf16 %v66_v24, %v58_v23  ;;  %v92_v23 = vld [vmem:[%s2309_s0 + $0x238] sm:$0xff] }
  0x65   :  { %v154_v42 = vpack.c.bf16 %v34_v36, %v26_v35  ;;  %v100_v24 = vld [vmem:[%s2309_s0 + $0x278] sm:$0xff] }
  0x71   :  { %762 = vmatmul.bf16.gmra.mxu0 %v189_v52 }
  0x72   :  { %811 = vmatmul.bf16.gmra.mxu1 %v190_v53 }
  0x73   :  { %860 = vmatmul.bf16.gmra.mxu2 %v191_v54 }
  0x74   :  { %909 = vmatmul.bf16.gmra.mxu3 %v192_v55 }
  0x81   :  { %767 = vmatmul.bf16.gmra.mxu0 %v197_v12 }
  0x82   :  { %816 = vmatmul.bf16.gmra.mxu1 %v198_v13 }
  0x83   :  { %865 = vmatmul.bf16.gmra.mxu2 %v199_v17 }
  0x84   :  { %914 = vmatmul.bf16.gmra.mxu3 %v200_v18 }
  0x91   :  { %772 = vmatmul.bf16.gmra.mxu0 %v205_v28  ;;  %v68_v28 = vld [vmem:[%s2309_s0 + $0x178] sm:$0xff] }
  0x92   :  { %821 = vmatmul.bf16.gmra.mxu1 %v206_v29  ;;  %v172_v38 = vpack.c.bf16 %v68_v28, %v60_v27 }
  0x93   :  { %870 = vmatmul.bf16.gmra.mxu2 %v207_v30 }
  0x94   :  { %919 = vmatmul.bf16.gmra.mxu3 %v208_v31  ;;  %v169_v31 = vpack.c.bf16 %v65_v22, %v57_v21  ;;  %v91_v21 = vld [vmem:[%s2309_s0 + $0x230] sm:$0xff] }
  0x95   :  { %v99_v22 = vld [vmem:[%s2309_s0 + $0x270] sm:$0xff] }
  0x9e   :  { %v738_v43 = vpop.f32.mrf.mxu0 }
  0x9f   :  { %v787_v44 = vpop.f32.mrf.mxu1  ;;  %v739_v47 = vadd.f32 %v1996_v32, %v738_v43 }
  0xa1   :  { %v788_v48 = vadd.f32 %v787_v44, %v739_v47  ;;  %933 = vmatmul.bf16.vlgmr.msrb.gmra.mxu0 %v153_v41 }
  0xa2   :  { %982 = vmatmul.bf16.vlgmr.msrb.gmra.mxu1 %v154_v42 }
  0xa3   :  { %1031 = vmatmul.bf16.vlgmr.msrb.gmra.mxu2 %v155_v45 }
  0xa4   :  { %1080 = vmatmul.bf16.vlgmr.msrb.gmra.mxu3 %v156_v46 }
  0xa6   :  { %v836_v49 = vpop.f32.mrf.mxu2  ;;  %v740_v52 = vpop.f32.mrf.mxu0 }
  0xa7   :  { %v885_v50 = vpop.f32.mrf.mxu3  ;;  %v837_v51 = vadd.f32 %v836_v49, %v788_v48  ;;  %v789_v53 = vpop.f32.mrf.mxu1  ;;  %v741_v54 = vadd.f32 %v1996_v32, %v740_v52  ;;  %v74_v52 = vld [vmem:[%s2309_s0 + $0x1a8] sm:$0xff] }
  0xa9   :  { %v2024_v55 = vadd.f32 %v885_v50, %v837_v51  ;;  %v790_v56 = vadd.f32 %v789_v53, %v741_v54  ;;  %v73_v50 = vld [vmem:[%s2309_s0 + $0x1a0] sm:$0xff]  ;;  %v82_v53 = vld [vmem:[%s2309_s0 + $0x1e8] sm:$0xff]  ;;  %v75_v54 = vld [vmem:[%s2309_s0 + $0x1b0] sm:$0xff] }
  0xaa   :  { %v81_v51 = vld [vmem:[%s2309_s0 + $0x1e0] sm:$0xff]  ;;  %v178_v62 = vpack.c.bf16 %v82_v53, %v74_v52  ;;  %v107_v52 = vld [vmem:[%s2309_s0 + $0x2b0] sm:$0xff] }
  0xab   :  { %v177_v61 = vpack.c.bf16 %v81_v51, %v73_v50  ;;  %v106_v50 = vld [vmem:[%s2309_s0 + $0x2a8] sm:$0xff]  ;;  %v115_v53 = vld [vmem:[%s2309_s0 + $0x2f0] sm:$0xff] }
  0xac   :  { %v114_v51 = vld [vmem:[%s2309_s0 + $0x2e8] sm:$0xff] }
  0xae   :  { %v838_v1 = vpop.f32.mrf.mxu2  ;;  %v743_v6 = vpop.f32.mrf.mxu0 }
  0xaf   :  { %v887_v2 = vpop.f32.mrf.mxu3  ;;  %v839_v5 = vadd.f32 %v838_v1, %v790_v56  ;;  %v792_v7 = vpop.f32.mrf.mxu1  ;;  %v744_v10 = vadd.f32 %v1996_v32, %v743_v6  ;;  %v83_v56 = vld [vmem:[%s2309_s0 + $0x1f0] sm:$0xff] }
  0xb1   :  { %v2051_v11 = vadd.f32 %v887_v2, %v839_v5  ;;  %v793_v12 = vadd.f32 %v792_v7, %v744_v10  ;;  %938 = vmatmul.bf16.gmra.mxu0 %v161_v3  ;;  %v179_v2 = vpack.c.bf16 %v83_v56, %v75_v54  ;;  %v180_v3 = vpack.c.bf16 %v84_v58, %v76_v57  ;;  %v108_v54 = vld [vmem:[%s2309_s0 + $0x2b8] sm:$0xff] }
  0xb2   :  { %987 = vmatmul.bf16.gmra.mxu1 %v162_v4  ;;  %v116_v56 = vld [vmem:[%s2309_s0 + $0x2f8] sm:$0xff] }
  0xb3   :  { %1036 = vmatmul.bf16.gmra.mxu2 %v163_v8 }
  0xb4   :  { %1085 = vmatmul.bf16.gmra.mxu3 %v164_v9 }
  0xb6   :  { %v841_v13 = vpop.f32.mrf.mxu2  ;;  %v745_v16 = vpop.f32.mrf.mxu0 }
  0xb7   :  { %v890_v14 = vpop.f32.mrf.mxu3  ;;  %v842_v15 = vadd.f32 %v841_v13, %v793_v12  ;;  %v794_v17 = vpop.f32.mrf.mxu1  ;;  %v746_v18 = vadd.f32 %v1996_v32, %v745_v16  ;;  %v89_v16 = vld [vmem:[%s2309_s0 + $0x220] sm:$0xff] }
  0xb9   :  { %v2054_v19 = vadd.f32 %v890_v14, %v842_v15  ;;  %v795_v20 = vadd.f32 %v794_v17, %v746_v18  ;;  %v97_v17 = vld [vmem:[%s2309_s0 + $0x260] sm:$0xff]  ;;  %v90_v18 = vld [vmem:[%s2309_s0 + $0x228] sm:$0xff] }
  0xba   :  { %v185_v27 = vpack.c.bf16 %v97_v17, %v89_v16  ;;  %v121_v16 = vld [vmem:[%s2309_s0 + $0x320] sm:$0xff] }
  0xbb   :  { %v129_v17 = vld [vmem:[%s2309_s0 + $0x360] sm:$0xff] }
  0xbe   :  { %v843_v29 = vpop.f32.mrf.mxu2  ;;  %v748_v35 = vpop.f32.mrf.mxu0 }
  0xbf   :  { %v892_v30 = vpop.f32.mrf.mxu3  ;;  %v844_v34 = vadd.f32 %v843_v29, %v795_v20  ;;  %v797_v36 = vpop.f32.mrf.mxu1  ;;  %v749_v39 = vadd.f32 %v1996_v32, %v748_v35  ;;  %v98_v20 = vld [vmem:[%s2309_s0 + $0x268] sm:$0xff] }
  0xc0   :  { %v186_v28 = vpack.c.bf16 %v98_v20, %v90_v18  ;;  %v122_v18 = vld [vmem:[%s2309_s0 + $0x328] sm:$0xff] }
  0xc1   :  { %v2081_v40 = vadd.f32 %v892_v30, %v844_v34  ;;  %v798_v41 = vadd.f32 %v797_v36, %v749_v39  ;;  %943 = vmatmul.bf16.gmra.mxu0 %v169_v31  ;;  %v188_v34 = vpack.c.bf16 %v100_v24, %v92_v23  ;;  %v130_v20 = vld [vmem:[%s2309_s0 + $0x368] sm:$0xff]  ;;  %v124_v23 = vld [vmem:[%s2309_s0 + $0x338] sm:$0xff] }
  0xc2   :  { %992 = vmatmul.bf16.gmra.mxu1 %v170_v33  ;;  %v187_v33 = vpack.c.bf16 %v99_v22, %v91_v21  ;;  %v123_v21 = vld [vmem:[%s2309_s0 + $0x330] sm:$0xff]  ;;  %v132_v24 = vld [vmem:[%s2309_s0 + $0x378] sm:$0xff] }
  0xc3   :  { %1041 = vmatmul.bf16.gmra.mxu2 %v171_v37  ;;  %v131_v22 = vld [vmem:[%s2309_s0 + $0x370] sm:$0xff] }
  0xc4   :  { %1090 = vmatmul.bf16.gmra.mxu3 %v172_v38 }
  0xc6   :  { %v846_v42 = vpop.f32.mrf.mxu2  ;;  %v750_v45 = vpop.f32.mrf.mxu0 }
  0xc7   :  { %v895_v43 = vpop.f32.mrf.mxu3  ;;  %v847_v44 = vadd.f32 %v846_v42, %v798_v41  ;;  %v799_v46 = vpop.f32.mrf.mxu1  ;;  %v751_v47 = vadd.f32 %v1996_v32, %v750_v45 }
  0xc9   :  { %v2084_v48 = vadd.f32 %v895_v43, %v847_v44  ;;  %v800_v49 = vadd.f32 %v799_v46, %v751_v47  ;;  %v105_v47 = vld [vmem:[%s2309_s0 + $0x2a0] sm:$0xff] }
  0xce   :  { %v848_v59 = vpop.f32.mrf.mxu2  ;;  %v753_v0 = vpop.f32.mrf.mxu0 }
  0xcf   :  { %v897_v60 = vpop.f32.mrf.mxu3  ;;  %v849_v63 = vadd.f32 %v848_v59, %v800_v49  ;;  %v802_v1 = vpop.f32.mrf.mxu1  ;;  %v754_v4 = vadd.f32 %v1996_v32, %v753_v0  ;;  %v113_v49 = vld [vmem:[%s2309_s0 + $0x2e0] sm:$0xff]  ;;  %v195_v0 = vpack.c.bf16 %v115_v53, %v107_v52  ;;  %v138_v52 = vld [vmem:[%s2309_s0 + $0x3a8] sm:$0xff] }
  0xd0   :  { %v193_v59 = vpack.c.bf16 %v113_v49, %v105_v47  ;;  %v146_v53 = vld [vmem:[%s2309_s0 + $0x3e8] sm:$0xff] }
  0xd1   :  { %v2111_v5 = vadd.f32 %v897_v60, %v849_v63  ;;  %v803_v6 = vadd.f32 %v802_v1, %v754_v4  ;;  %948 = vmatmul.bf16.gmra.mxu0 %v177_v61  ;;  %v194_v60 = vpack.c.bf16 %v114_v51, %v106_v50  ;;  %v196_v1 = vpack.c.bf16 %v116_v56, %v108_v54  ;;  %v137_v50 = vld [vmem:[%s2309_s0 + $0x3a0] sm:$0xff]  ;;  %v139_v54 = vld [vmem:[%s2309_s0 + $0x3b0] sm:$0xff] }
  0xd2   :  { %997 = vmatmul.bf16.gmra.mxu1 %v178_v62  ;;  %v145_v51 = vld [vmem:[%s2309_s0 + $0x3e0] sm:$0xff]  ;;  %v147_v56 = vld [vmem:[%s2309_s0 + $0x3f0] sm:$0xff] }
  0xd3   :  { %1046 = vmatmul.bf16.gmra.mxu2 %v179_v2 }
  0xd4   :  { %1095 = vmatmul.bf16.gmra.mxu3 %v180_v3 }
  0xd6   :  { %v851_v7 = vpop.f32.mrf.mxu2  ;;  %v755_v10 = vpop.f32.mrf.mxu0 }
  0xd7   :  { %v900_v8 = vpop.f32.mrf.mxu3  ;;  %v852_v9 = vadd.f32 %v851_v7, %v803_v6  ;;  %v804_v12 = vpop.f32.mrf.mxu1  ;;  %v756_v13 = vadd.f32 %v1996_v32, %v755_v10 }
  0xd9   :  { %v2114_v14 = vadd.f32 %v900_v8, %v852_v9  ;;  %v805_v15 = vadd.f32 %v804_v12, %v756_v13 }
  0xde   :  { %v853_v25 = vpop.f32.mrf.mxu2  ;;  %v758_v30 = vpop.f32.mrf.mxu0 }
  0xdf   :  { %v902_v26 = vpop.f32.mrf.mxu3  ;;  %v854_v29 = vadd.f32 %v853_v25, %v805_v15  ;;  %v807_v31 = vpop.f32.mrf.mxu1  ;;  %v759_v35 = vadd.f32 %v1996_v32, %v758_v30 }
  0xe1   :  { %v2141_v36 = vadd.f32 %v902_v26, %v854_v29  ;;  %953 = vmatmul.bf16.gmra.mxu0 %v185_v27  ;;  %v808_v37 = vadd.f32 %v807_v31, %v759_v35  ;;  %v201_v27 = vpack.c.bf16 %v129_v17, %v121_v16 }
  0xe2   :  { %1002 = vmatmul.bf16.gmra.mxu1 %v186_v28  ;;  %v202_v28 = vpack.c.bf16 %v130_v20, %v122_v18 }
  0xe3   :  { %1051 = vmatmul.bf16.gmra.mxu2 %v187_v33  ;;  %v203_v33 = vpack.c.bf16 %v131_v22, %v123_v21 }
  0xe4   :  { %1100 = vmatmul.bf16.gmra.mxu3 %v188_v34  ;;  %v204_v34 = vpack.c.bf16 %v132_v24, %v124_v23 }
  0xe6   :  { %v856_v38 = vpop.f32.mrf.mxu2  ;;  %v760_v42 = vpop.f32.mrf.mxu0 }
  0xe7   :  { %v905_v39 = vpop.f32.mrf.mxu3  ;;  %v857_v41 = vadd.f32 %v856_v38, %v808_v37  ;;  %v809_v43 = vpop.f32.mrf.mxu1  ;;  %v761_v44 = vadd.f32 %v1996_v32, %v760_v42 }
  0xe9   :  { %v2144_v45 = vadd.f32 %v905_v39, %v857_v41  ;;  %v810_v46 = vadd.f32 %v809_v43, %v761_v44 }
  0xee   :  { %v858_v57 = vpop.f32.mrf.mxu2  ;;  %v763_v62 = vpop.f32.mrf.mxu0 }
  0xef   :  { %v907_v58 = vpop.f32.mrf.mxu3  ;;  %v859_v61 = vadd.f32 %v858_v57, %v810_v46  ;;  %v812_v63 = vpop.f32.mrf.mxu1  ;;  %v764_v2 = vadd.f32 %v1996_v32, %v763_v62  ;;  %v140_v57 = vld [vmem:[%s2309_s0 + $0x3b8] sm:$0xff]  ;;  %v210_v62 = vpack.c.bf16 %v146_v53, %v138_v52 }
  0xf1   :  { %v2171_v3 = vadd.f32 %v907_v58, %v859_v61  ;;  %v813_v4 = vadd.f32 %v812_v63, %v764_v2  ;;  %958 = vmatmul.bf16.gmra.mxu0 %v193_v59  ;;  %v148_v58 = vld [vmem:[%s2309_s0 + $0x3f8] sm:$0xff]  ;;  %v209_v61 = vpack.c.bf16 %v145_v51, %v137_v50  ;;  %v211_v2 = vpack.c.bf16 %v147_v56, %v139_v54 }
  0xf2   :  { %1007 = vmatmul.bf16.gmra.mxu1 %v194_v60 }
  0xf3   :  { %1056 = vmatmul.bf16.gmra.mxu2 %v195_v0 }
  0xf4   :  { %1105 = vmatmul.bf16.gmra.mxu3 %v196_v1 }
  0xf6   :  { %v861_v6 = vpop.f32.mrf.mxu2  ;;  %v765_v9 = vpop.f32.mrf.mxu0 }
  0xf7   :  { %v910_v7 = vpop.f32.mrf.mxu3  ;;  %v862_v8 = vadd.f32 %v861_v6, %v813_v4  ;;  %v814_v10 = vpop.f32.mrf.mxu1  ;;  %v766_v12 = vadd.f32 %v1996_v32, %v765_v9  ;;  %v212_v4 = vpack.c.bf16 %v148_v58, %v140_v57 }
  0xf9   :  { %v2174_v13 = vadd.f32 %v910_v7, %v862_v8  ;;  %v815_v15 = vadd.f32 %v814_v10, %v766_v12 }
  0xfe   :  { %v863_v25 = vpop.f32.mrf.mxu2  ;;  %v768_v30 = vpop.f32.mrf.mxu0 }
  0xff   :  { %v912_v26 = vpop.f32.mrf.mxu3  ;;  %v864_v29 = vadd.f32 %v863_v25, %v815_v15  ;;  %v817_v31 = vpop.f32.mrf.mxu1  ;;  %v769_v35 = vadd.f32 %v1996_v32, %v768_v30 }
 0x101   :  { %v2201_v37 = vadd.f32 %v912_v26, %v864_v29  ;;  %v818_v38 = vadd.f32 %v817_v31, %v769_v35  ;;  %963 = vmatmul.bf16.gmra.mxu0 %v201_v27 }
 0x102   :  { %1012 = vmatmul.bf16.gmra.mxu1 %v202_v28 }
 0x103   :  { %1061 = vmatmul.bf16.gmra.mxu2 %v203_v33 }
 0x104   :  { %1110 = vmatmul.bf16.gmra.mxu3 %v204_v34 }
 0x106   :  { %v866_v39 = vpop.f32.mrf.mxu2  ;;  %v770_v43 = vpop.f32.mrf.mxu0 }
 0x107   :  { %v915_v41 = vpop.f32.mrf.mxu3  ;;  %v867_v42 = vadd.f32 %v866_v39, %v818_v38  ;;  %v819_v44 = vpop.f32.mrf.mxu1  ;;  %v771_v46 = vadd.f32 %v1996_v32, %v770_v43 }
 0x109   :  { %v2204_v47 = vadd.f32 %v915_v41, %v867_v42  ;;  %v820_v49 = vadd.f32 %v819_v44, %v771_v46 }
 0x10e   :  { %v868_v59 = vpop.f32.mrf.mxu2  ;;  %v773_v0 = vpop.f32.mrf.mxu0 }
 0x10f   :  { %v917_v60 = vpop.f32.mrf.mxu3  ;;  %v869_v63 = vadd.f32 %v868_v59, %v820_v49  ;;  %v822_v1 = vpop.f32.mrf.mxu1  ;;  %v774_v6 = vadd.f32 %v1996_v32, %v773_v0 }
 0x111   :  { %v2231_v7 = vadd.f32 %v917_v60, %v869_v63  ;;  %v823_v8 = vadd.f32 %v822_v1, %v774_v6  ;;  %968 = vmatmul.bf16.gmra.mxu0 %v209_v61 }
 0x112   :  { %1017 = vmatmul.bf16.gmra.mxu1 %v210_v62 }
 0x113   :  { %1066 = vmatmul.bf16.gmra.mxu2 %v211_v2 }
 0x114   :  { %1115 = vmatmul.bf16.gmra.mxu3 %v212_v4 }
 0x116   :  { %v871_v9 = vpop.f32.mrf.mxu2  ;;  %v775_v15 = vpop.f32.mrf.mxu0 }
 0x117   :  { %v920_v10 = vpop.f32.mrf.mxu3  ;;  %v872_v12 = vadd.f32 %v871_v9, %v823_v8  ;;  %v824_v16 = vpop.f32.mrf.mxu1  ;;  %v776_v17 = vadd.f32 %v1996_v32, %v775_v15 }
 0x119   :  { %v2234_v18 = vadd.f32 %v920_v10, %v872_v12  ;;  %v825_v20 = vadd.f32 %v824_v16, %v776_v17 }
 0x11e   :  { %v873_v21 = vpop.f32.mrf.mxu2  ;;  %v934_v24 = vpop.f32.mrf.mxu0 }
 0x11f   :  { %v922_v22 = vpop.f32.mrf.mxu3  ;;  %v874_v23 = vadd.f32 %v873_v21, %v825_v20  ;;  %v983_v25 = vpop.f32.mrf.mxu1  ;;  %v935_v26 = vadd.f32 %v934_v24, %v2024_v55 }
 0x121   :  { %v2237_v27 = vadd.f32 %v922_v22, %v874_v23  ;;  %v984_v28 = vadd.f32 %v983_v25, %v935_v26 }
 0x126   :  { %v1032_v29 = vpop.f32.mrf.mxu2  ;;  %v936_v33 = vpop.f32.mrf.mxu0 }
 0x127   :  { %v1081_v30 = vpop.f32.mrf.mxu3  ;;  %v1033_v31 = vadd.f32 %v1032_v29, %v984_v28  ;;  %v985_v34 = vpop.f32.mrf.mxu1  ;;  %v937_v32 = vadd.f32 %v936_v33, %v2051_v11 }
 0x129   :  { %v2240_v35 = vadd.f32 %v1081_v30, %v1033_v31  ;;  %v986_v38 = vadd.f32 %v985_v34, %v937_v32 }
 0x12e   :  { %v1034_v39 = vpop.f32.mrf.mxu2  ;;  %v939_v43 = vpop.f32.mrf.mxu0 }
 0x12f   :  { %v1083_v41 = vpop.f32.mrf.mxu3  ;;  %v1035_v42 = vadd.f32 %v1034_v39, %v986_v38  ;;  %v988_v44 = vpop.f32.mrf.mxu1  ;;  %v940_v55 = vadd.f32 %v939_v43, %v2054_v19 }
 0x131   :  { %v2243_v46 = vadd.f32 %v1083_v41, %v1035_v42  ;;  %v989_v49 = vadd.f32 %v988_v44, %v940_v55 }
 0x136   :  { %v1037_v50 = vpop.f32.mrf.mxu2  ;;  %v941_v53 = vpop.f32.mrf.mxu0 }
 0x137   :  { %v1086_v51 = vpop.f32.mrf.mxu3  ;;  %v1038_v52 = vadd.f32 %v1037_v50, %v989_v49  ;;  %v990_v54 = vpop.f32.mrf.mxu1  ;;  %v942_v11 = vadd.f32 %v941_v53, %v2081_v40 }
 0x139   :  { %v2246_v56 = vadd.f32 %v1086_v51, %v1038_v52  ;;  %v991_v57 = vadd.f32 %v990_v54, %v942_v11 }
 0x13e   :  { %v1039_v58 = vpop.f32.mrf.mxu2  ;;  %v944_v61 = vpop.f32.mrf.mxu0 }
 0x13f   :  { %v1088_v59 = vpop.f32.mrf.mxu3  ;;  %v1040_v60 = vadd.f32 %v1039_v58, %v991_v57  ;;  %v993_v62 = vpop.f32.mrf.mxu1  ;;  %v945_v19 = vadd.f32 %v944_v61, %v2084_v48 }
 0x141   :  { %v2249_v63 = vadd.f32 %v1088_v59, %v1040_v60  ;;  %v994_v0 = vadd.f32 %v993_v62, %v945_v19 }
 0x146   :  { %v1042_v1 = vpop.f32.mrf.mxu2  ;;  %v946_v6 = vpop.f32.mrf.mxu0 }
 0x147   :  { %v1091_v2 = vpop.f32.mrf.mxu3  ;;  %v1043_v4 = vadd.f32 %v1042_v1, %v994_v0  ;;  %v995_v8 = vpop.f32.mrf.mxu1  ;;  %v947_v40 = vadd.f32 %v946_v6, %v2111_v5 }
 0x149   :  { %v2252_v9 = vadd.f32 %v1091_v2, %v1043_v4  ;;  %v996_v10 = vadd.f32 %v995_v8, %v947_v40 }
 0x14e   :  { %v1044_v12 = vpop.f32.mrf.mxu2  ;;  %v949_v17 = vpop.f32.mrf.mxu0 }
 0x14f   :  { %v1093_v15 = vpop.f32.mrf.mxu3  ;;  %v1045_v16 = vadd.f32 %v1044_v12, %v996_v10  ;;  %v998_v20 = vpop.f32.mrf.mxu1  ;;  %v950_v48 = vadd.f32 %v949_v17, %v2114_v14 }
 0x151   :  { %v2255_v21 = vadd.f32 %v1093_v15, %v1045_v16  ;;  %v999_v22 = vadd.f32 %v998_v20, %v950_v48 }
 0x156   :  { %v1047_v23 = vpop.f32.mrf.mxu2  ;;  %v951_v26 = vpop.f32.mrf.mxu0 }
 0x157   :  { %v1096_v24 = vpop.f32.mrf.mxu3  ;;  %v1048_v25 = vadd.f32 %v1047_v23, %v999_v22  ;;  %v1000_v28 = vpop.f32.mrf.mxu1  ;;  %v952_v5 = vadd.f32 %v951_v26, %v2141_v36 }
 0x159   :  { %v2258_v29 = vadd.f32 %v1096_v24, %v1048_v25  ;;  %v1001_v30 = vadd.f32 %v1000_v28, %v952_v5 }
 0x15e   :  { %v1049_v31 = vpop.f32.mrf.mxu2  ;;  %v954_v32 = vpop.f32.mrf.mxu0 }
 0x15f   :  { %v1098_v33 = vpop.f32.mrf.mxu3  ;;  %v1050_v34 = vadd.f32 %v1049_v31, %v1001_v30  ;;  %v1003_v38 = vpop.f32.mrf.mxu1  ;;  %v955_v14 = vadd.f32 %v954_v32, %v2144_v45 }
 0x161   :  { %v2261_v39 = vadd.f32 %v1098_v33, %v1050_v34  ;;  %v1004_v41 = vadd.f32 %v1003_v38, %v955_v14 }
 0x166   :  { %v1052_v42 = vpop.f32.mrf.mxu2  ;;  %v956_v55 = vpop.f32.mrf.mxu0 }
 0x167   :  { %v1101_v43 = vpop.f32.mrf.mxu3  ;;  %v1053_v44 = vadd.f32 %v1052_v42, %v1004_v41  ;;  %v1005_v49 = vpop.f32.mrf.mxu1  ;;  %v957_v36 = vadd.f32 %v956_v55, %v2171_v3 }
 0x169   :  { %v2264_v50 = vadd.f32 %v1101_v43, %v1053_v44  ;;  %v1006_v51 = vadd.f32 %v1005_v49, %v957_v36 }
 0x16e   :  { %v1054_v52 = vpop.f32.mrf.mxu2  ;;  %v959_v11 = vpop.f32.mrf.mxu0 }
 0x16f   :  { %v1103_v53 = vpop.f32.mrf.mxu3  ;;  %v1055_v54 = vadd.f32 %v1054_v52, %v1006_v51  ;;  %v1008_v57 = vpop.f32.mrf.mxu1  ;;  %v960_v43 = vadd.f32 %v959_v11, %v2174_v13  ;;  %v1129_v11 = vmax.f32 %v2264_v50, 0.0  ;;  %v1124_v50 = vmax.f32 %v2249_v63, 0.0 }
 0x171   :  { %v1104_v58 = vadd.f32 %v1103_v53, %v1055_v54  ;;  %v1009_v36 = vadd.f32 %v1008_v57, %v960_v43  ;;  %v1128_v57 = vmax.f32 %v2261_v39, 0.0  ;;  %v1123_v39 = vmax.f32 %v2246_v56, 0.0 }
 0x172   :  { %v1139_v56 = vstv %s2311_s4 }
 0x173   :  { %v1130_v13 = vmax.f32 %v1104_v58, 0.0  ;;  %v1125_v58 = vmax.f32 %v2252_v9, 0.0  ;;  %v1137_v9 = vld [vmem:[%s2310_s3] sm:$0x1] }
 0x176   :  { %v1057_v45 = vpop.f32.mrf.mxu2  ;;  %v961_v60 = vpop.f32.mrf.mxu0 }
 0x177   :  { %v1106_v59 = vpop.f32.mrf.mxu3  ;;  %v1010_v61 = vpop.f32.mrf.mxu1  ;;  %v1058_v51 = vadd.f32 %v1057_v45, %v1009_v36  ;;  %v1127_v45 = vmax.f32 %v2258_v29, 0.0  ;;  %v1122_v29 = vmax.f32 %v2243_v46, 0.0 }
 0x179   :  { %v1107_v53 = vadd.f32 %v1106_v59, %v1058_v51  ;;  %v1126_v59 = vmax.f32 %v2255_v21, 0.0  ;;  %v1121_v21 = vmax.f32 %v2240_v35, 0.0 }
 0x17e   :  { %v1059_v62 = vpop.f32.mrf.mxu2  ;;  %v964_v0 = vpop.f32.mrf.mxu0 }
 0x17f   :  { %v1108_v19 = vpop.f32.mrf.mxu3  ;;  %v1013_v1 = vpop.f32.mrf.mxu1  ;;  %v965_v31 = vadd.f32 %v964_v0, %v2204_v47 }
 0x186   :  { %v1062_v2 = vpop.f32.mrf.mxu2  ;;  %v966_v3 = vpop.f32.mrf.mxu0 }
 0x187   :  { %v1111_v4 = vpop.f32.mrf.mxu3  ;;  %v1015_v6 = vpop.f32.mrf.mxu1  ;;  %v967_v23 = vadd.f32 %v966_v3, %v2231_v7 }
 0x189   :  { %v1016_v33 = vadd.f32 %v1015_v6, %v967_v23 }
 0x18e   :  { %v1064_v8 = vpop.f32.mrf.mxu2  ;;  %v969_v10 = vpop.f32.mrf.mxu0 }
 0x18f   :  { %v1113_v40 = vpop.f32.mrf.mxu3  ;;  %v1018_v12 = vpop.f32.mrf.mxu1  ;;  %v970_v20 = vadd.f32 %v969_v10, %v2234_v18  ;;  %v1065_v32 = vadd.f32 %v1064_v8, %v1016_v33  ;;  %v962_v18 = vadd.f32 %v961_v60, %v2201_v37  ;;  %v1131_v60 = vmax.f32 %v1107_v53, 0.0 }
 0x191   :  { %v1019_v24 = vadd.f32 %v1018_v12, %v970_v20  ;;  %v1114_v41 = vadd.f32 %v1113_v40, %v1065_v32  ;;  %v1011_v44 = vadd.f32 %v1010_v61, %v962_v18 }
 0x193   :  { %v1060_v47 = vadd.f32 %v1059_v62, %v1011_v44  ;;  %v1134_v49 = vmax.f32 %v1114_v41, 0.0 }
 0x195   :  { %v1109_v52 = vadd.f32 %v1108_v19, %v1060_v47 }
 0x196   :  { %v1067_v15 = vpop.f32.mrf.mxu2  ;;  %v971_v17 = vpop.f32.mrf.mxu0 }
 0x197   :  { %v1116_v16 = vpop.f32.mrf.mxu3  ;;  %v972_v48 = vadd.f32 %v971_v17, %v2237_v27  ;;  %v1020_v22 = vpop.f32.mrf.mxu1  ;;  %v1068_v28 = vadd.f32 %v1067_v15, %v1019_v24  ;;  %v1014_v27 = vadd.f32 %v1013_v1, %v965_v31  ;;  %v1132_v54 = vmax.f32 %v1109_v52, 0.0 }
 0x199   :  { %v1021_v25 = vadd.f32 %v1020_v22, %v972_v48  ;;  %v1117_v38 = vadd.f32 %v1116_v16, %v1068_v28  ;;  %v1063_v7 = vadd.f32 %v1062_v2, %v1014_v27 }
 0x19b   :  { %v1135_v42 = vmax.f32 %v1117_v38, 0.0  ;;  %v1112_v55 = vadd.f32 %v1111_v4, %v1063_v7 }
 0x19d   :  { %v1133_v37 = vmax.f32 %v1112_v55, 0.0 }
 0x19e   :  { %v1069_v26 = vpop.f32.mrf.mxu2 }
 0x19f   :  { %v1070_v5 = vadd.f32 %v1069_v26, %v1021_v25  ;;  %v1118_v30 = vpop.f32.mrf.mxu3 }
 0x1a1   :  { %v1119_v34 = vadd.f32 %v1118_v30, %v1070_v5 }
 0x1a3   :  { %v1136_v14 = vmax.f32 %v1119_v34, 0.0 }
 0x1a5   :  { %1492 = vmatpush.xpose.msk.msra.mxu0 %vm1140_vm0, %v1136_v14 }
 0x1a9   :  { %1493 = vmatpush.xpose.msk.msra.mxu0 %vm1140_vm0, %v1135_v42 }
 0x1ad   :  { %1494 = vmatpush.xpose.msk.msra.mxu0 %vm1140_vm0, %v1134_v49 }
 0x1b1   :  { %1495 = vmatpush.xpose.msk.msra.mxu0 %vm1140_vm0, %v1133_v37 }
 0x1b5   :  { %1496 = vmatpush.xpose.msk.msra.mxu0 %vm1140_vm0, %v1132_v54 }
 0x1b9   :  { %1497 = vmatpush.xpose.msk.msra.mxu0 %vm1140_vm0, %v1131_v60 }
 0x1bd   :  { %1498 = vmatpush.xpose.msk.msra.mxu0 %vm1140_vm0, %v1130_v13 }
 0x1c1   :  { %1499 = vmatpush.xpose.msk.msra.mxu0 %vm1140_vm0, %v1129_v11 }
 0x1c5   :  { %1500 = vmatpush.xpose.msk.msra.mxu0 %vm1140_vm0, %v1128_v57 }
 0x1c9   :  { %1501 = vmatpush.xpose.msk.msra.mxu0 %vm1140_vm0, %v1127_v45 }
 0x1cd   :  { %1502 = vmatpush.xpose.msk.msra.mxu0 %vm1140_vm0, %v1126_v59 }
 0x1d1   :  { %1503 = vmatpush.xpose.msk.msra.mxu0 %vm1140_vm0, %v1125_v58 }
 0x1d5   :  { %1504 = vmatpush.xpose.msk.msra.mxu0 %vm1140_vm0, %v1124_v50 }
 0x1d9   :  { %1505 = vmatpush.xpose.msk.msra.mxu0 %vm1140_vm0, %v1123_v39 }
 0x1dd   :  { %1506 = vmatpush.xpose.msk.msra.mxu0 %vm1140_vm0, %v1122_v29 }
 0x1e1   :  { %1507 = vmatpush.xpose.msk.msra.mxu0 %vm1140_vm0, %v1121_v21 }
 0x1e4   :  { %1508 = vmatmul.msk.f32.vlgmr.msra.gmra.mxu0 %vm1140_vm0, %v1137_v9 }
 0x261   :  { %v1209_v63 = vpop.f32.mrf.mxu0 }
 0x262   :  { %v1210_v61 = vadd.f32 %v1209_v63, %v1139_v56 }
 0x264   :  { %v1509_v62 = vmul.f32 -1.442695, %v1210_v61 }
 0x266   :  { %1575 = vpow2.f32 %v1509_v62 }
 0x26c   :  { %v1576_v46 = vpop.eup %1575 }
 0x26d   :  { %v1215_v19 = vadd.f32 1.0, %v1576_v46 }
 0x26f   :  { %1577 = vrcp.f32 %v1215_v19  ;;  %v1227_v2 = vand.u32 2147483648, %v1215_v19  ;;  %v1225_v3 = vand.u32 2147483647, %v1215_v19  ;;  %vm1221_vm2 = vweird.f32 %v1215_v19 }
 0x271   :  { %v1228_v8 = vor.u32 1.1754944e-38, %v1227_v2  ;;  %vm1226_vm4 = vcmp.eq.f32.partialorder %v1225_v3, 8.507059e+37 }
 0x275   :  { %v1578_v35 = vpop.eup %1577 }
 0x276   :  { %v1217_v0 = vmul.f32 %v1578_v35, %v1215_v19  ;;  %vm1222_vm1 = vweird.f32 %v1578_v35 }
 0x277   :  { %vm1223_vm3 = vmor %vm1221_vm2, %vm1222_vm1 }
 0x278   :  { %v1218_v1 = vsub.f32 1.0, %v1217_v0 }
 0x27a   :  { %v1219_v4 = vmul.f32 %v1578_v35, %v1218_v1 }
 0x27c   :  { %v1220_v6 = vadd.f32 %v1578_v35, %v1219_v4 }
 0x27e   :  { %v1224_v40 = vsel %vm1223_vm3, %v1578_v35, %v1220_v6 }
 0x27f   :  { %v1229_v10 = vsel %vm1226_vm4, %v1228_v8, %v1224_v40 }
 0x280   :  { %1231 = vst [vmem:[%s2312_s5] sm:$0x1] %v1229_v10 }

</bundles_post_ra>
